<compile_context>
chip_gen: v7x
topology: tpu7x:2x2x1
jax: 0.10.0
libtpu: 0.0.40
codegen_flags: <defaults>
</compile_context>

<pallas_src>
import jax
import jax.numpy as jnp
from jax.experimental import pallas as pl
from jax.experimental.pallas import tpu as pltpu

BN_EPS = 1e-5
H_PAD = 128  # lane-dense hidden width presented to the kernel


def _subnet_kernel(x_ref, w_ref, gb_ref, o_ref):
    # Fused Linear + bias on the MXU: x_ref carries a trailing ones column and
    # w_ref carries the bias as its last row, so one matmul gives x @ W.T + b.
    # bf16 operands, f32 accumulate.
    y = jnp.dot(x_ref[...], w_ref[...], preferred_element_type=jnp.float32)
    y = jnp.maximum(y, 0.0)  # ReLU (f32 VPU path)

    # BatchNorm1d (training mode): batch statistics over axis 0, biased variance.
    # Two independent cross-sublane reductions (no serial dependency on `mean`).
    inv_b = jnp.float32(1.0 / y.shape[0])
    s1 = jnp.sum(y, axis=0, keepdims=True)        # (1, H_PAD)
    s2 = jnp.sum(y * y, axis=0, keepdims=True)    # (1, H_PAD)
    mean = s1 * inv_b
    # Clamp: E[y^2] - mean^2 can cancel slightly negative in f32 -> NaN in rsqrt.
    var = jnp.maximum(s2 * inv_b - mean * mean, 0.0)

    # Fused BN affine: out = y * scale + shift (one FMA per element).
    scale = gb_ref[0:1, :] * jax.lax.rsqrt(var + BN_EPS)   # gamma * rsqrt(var+eps)
    shift = gb_ref[1:2, :] - mean * scale                  # beta - mean*scale

    # Dropout: identity (eval semantics).
    o_ref[...] = (y * scale + shift).astype(o_ref.dtype)


def pack_params(weight, bias, gamma, beta, h_pad=H_PAD):
    """One-time parameter packing (done at init, not per call).

    weight: (H, F_in); bias/gamma/beta: (H,).
    Returns:
      w_aug: (F_in + 1, h_pad) bf16 -- pre-transposed, zero-padded weight with
             the bias as its last row (bias fold for the matmul).
      gb   : (2, h_pad) f32 -- rows = [gamma, beta], zero-padded.
             NOTE: gamma MUST be zero-padded (scale=0 keeps padded lanes at 0).
    """
    H, F_in = weight.shape
    assert H <= h_pad
    w_aug = jnp.zeros((F_in + 1, h_pad), jnp.float32)
    w_aug = w_aug.at[:F_in, :H].set(jnp.transpose(weight).astype(jnp.float32))
    w_aug = w_aug.at[F_in, :H].set(bias.astype(jnp.float32))
    w_aug = w_aug.astype(jnp.bfloat16)  # halve HBM->VMEM bytes; f32 MXU accumulate

    gb = jnp.zeros((2, h_pad), jnp.float32)
    gb = gb.at[0, :H].set(gamma.astype(jnp.float32))
    gb = gb.at[1, :H].set(beta.astype(jnp.float32))
    # Invariant (see correctness note): padded gamma region must be exactly 0.
    return w_aug, gb


def subnetwork_categorical(x, w_aug, gb):
    """x: (B, F_in); w_aug: (F_in+1, H_PAD) bf16; gb: (2, H_PAD) f32.

    Returns the lane-dense padded output (B, H_PAD) f32; columns >= hidden_size
    are exactly 0. Consumers should keep working on the padded slab (or slice
    lazily) instead of forcing a narrow tensor back through HBM.
    """
    B = x.shape[0]
    h_pad = w_aug.shape[1]
    # Bias fold: append a ones column and present x in bf16. In production the
    # upstream producer should emit this (B, F_in+1) bf16 layout directly so
    # this stays a zero-cost layout convention rather than a per-call op.
    x_aug = jnp.concatenate(
        [x.astype(jnp.bfloat16), jnp.ones((B, 1), jnp.bfloat16)], axis=1)

    # Grid-free call: full arrays mapped straight into VMEM, no pipeline
    # machinery / double-buffering for a single-step kernel.
    return pl.pallas_call(
        _subnet_kernel,
        out_shape=jax.ShapeDtypeStruct((B, h_pad), jnp.float32),
        in_specs=[
            pl.BlockSpec(memory_space=pltpu.MemorySpace.VMEM),
            pl.BlockSpec(memory_space=pltpu.MemorySpace.VMEM),
            pl.BlockSpec(memory_space=pltpu.MemorySpace.VMEM),
        ],
        out_specs=pl.BlockSpec(memory_space=pltpu.MemorySpace.VMEM),
    )(x_aug, w_aug, gb)


def _reference(x, weight, bias, gamma, beta):
    """Pure-f32 reference of the module's forward (training-mode BN, eval dropout)."""
    y = x @ weight.T + bias
    y = jnp.maximum(y, 0.0)
    mean = jnp.mean(y, axis=0, keepdims=True)
    var = jnp.mean((y - mean) ** 2, axis=0, keepdims=True)
    y = (y - mean) / jnp.sqrt(var + BN_EPS)
    return y * gamma + beta


def _reference_bf16_inputs(x, weight, bias, gamma, beta):
    """Same math, but with x/W/b rounded to bf16 first (what the packed kernel consumes)."""
    xb = x.astype(jnp.bfloat16).astype(jnp.float32)
    wb = weight.astype(jnp.bfloat16).astype(jnp.float32)
    bb = bias.astype(jnp.bfloat16).astype(jnp.float32)
    return _reference(xb, wb, bb, gamma, beta)


if __name__ == "__main__":
    # Small shapes consistent with the module: batch=8, input_size_categorical=16,
    # hidden_size_categorical=32.
    B, F_IN, HID = 8, 16, 32

    key = jax.random.PRNGKey(0)
    kx, kw, kb = jax.random.split(key, 3)

    x = jax.random.normal(kx, (B, F_IN), dtype=jnp.float32)

    # Deterministic parameter init (PyTorch-like uniform(-1/sqrt(fan_in), 1/sqrt(fan_in)))
    bound = 1.0 / jnp.sqrt(jnp.float32(F_IN))
    weight = jax.random.uniform(kw, (HID, F_IN), minval=-bound, maxval=bound,
                                dtype=jnp.float32)
    bias = jax.random.uniform(kb, (HID,), minval=-bound, maxval=bound,
                              dtype=jnp.float32)
    gamma = jnp.ones((HID,), dtype=jnp.float32)   # BatchNorm1d weight init
    beta = jnp.zeros((HID,), dtype=jnp.float32)   # BatchNorm1d bias init

    # One-time packing (lane-dense padding, weight transpose, bias fold, bf16 cast).
    w_aug, gb = pack_params(weight, bias, gamma, beta)

    out_pad = subnetwork_categorical(x, w_aug, gb)
    out_pad = jax.block_until_ready(out_pad)
    assert out_pad.shape == (B, H_PAD)

    # Padded lanes must be exactly zero (zero-padded weight/bias/gamma invariant).
    assert bool(jnp.all(out_pad[:, HID:] == 0.0)), "padded lanes not zero"

    out = out_pad[:, :HID]  # slice only for verification against the reference

    # Tight check against the bf16-input-consistent reference (isolates kernel math).
    ref_bf16 = _reference_bf16_inputs(x, weight, bias, gamma, beta)
    assert jnp.allclose(out, ref_bf16, atol=5e-4, rtol=5e-4), \
        "mismatch vs bf16-consistent reference"

    # Loose check against the full-f32 reference (bounds the bf16 input rounding).
    ref_f32 = _reference(x, weight, bias, gamma, beta)
    assert jnp.allclose(out, ref_f32, atol=5e-2, rtol=5e-2), \
        "mismatch vs f32 reference"

    print("KERNEL_OK")
</pallas_src>

<mosaic_0001>
module attributes {stable_mosaic.version = 11 : i64} {
  func.func @_subnet_kernel(%arg0: memref<8x17xbf16, #tpu.memory_space<vmem>>, %arg1: memref<17x128xbf16, #tpu.memory_space<vmem>>, %arg2: memref<2x128xf32, #tpu.memory_space<vmem>>, %arg3: memref<8x128xf32, #tpu.memory_space<vmem>>) attributes {dimension_semantics = [], scalar_prefetch = 0 : i64, scratch_operands = 0 : i64, tpu.core_type = #tpu.core_type<tc>} {
    %c0 = arith.constant 0 : index
    %c0_0 = arith.constant 0 : index
    %0 = vector.load %arg0[%c0, %c0_0] : memref<8x17xbf16, #tpu.memory_space<vmem>>, vector<8x17xbf16>
    %c0_1 = arith.constant 0 : index
    %c0_2 = arith.constant 0 : index
    %1 = vector.load %arg1[%c0_1, %c0_2] : memref<17x128xbf16, #tpu.memory_space<vmem>>, vector<17x128xbf16>
    %cst = arith.constant dense<0.000000e+00> : vector<8x128xf32>
    %2 = tpu.matmul %0, %1, %cst {dimension_numbers = #tpu.dot_dimension_numbers<[1], [0], [0], [1], [0, 0, 1, 1], [], []>} : vector<8x17xbf16>, vector<17x128xbf16>, vector<8x128xf32> -> vector<8x128xf32>
    %cst_3 = arith.constant 0.000000e+00 : f32
    %3 = vector.broadcast %cst_3 : f32 to vector<8x128xf32>
    %4 = arith.maximumf %2, %3 : vector<8x128xf32>
    %cst_4 = arith.constant dense<0.000000e+00> : vector<128xf32>
    %5 = vector.multi_reduction <add>, %4, %cst_4 [0] : vector<8x128xf32> to vector<128xf32>
    %6 = vector.shape_cast %5 : vector<128xf32> to vector<1x128xf32>
    %7 = arith.mulf %4, %4 : vector<8x128xf32>
    %cst_5 = arith.constant dense<0.000000e+00> : vector<128xf32>
    %8 = vector.multi_reduction <add>, %7, %cst_5 [0] : vector<8x128xf32> to vector<128xf32>
    %9 = vector.shape_cast %8 : vector<128xf32> to vector<1x128xf32>
    %cst_6 = arith.constant 1.250000e-01 : f32
    %10 = vector.broadcast %cst_6 : f32 to vector<1x128xf32>
    %11 = arith.mulf %6, %10 : vector<1x128xf32>
    %cst_7 = arith.constant 1.250000e-01 : f32
    %12 = vector.broadcast %cst_7 : f32 to vector<1x128xf32>
    %13 = arith.mulf %9, %12 : vector<1x128xf32>
    %14 = arith.mulf %11, %11 : vector<1x128xf32>
    %15 = arith.subf %13, %14 : vector<1x128xf32>
    %cst_8 = arith.constant 0.000000e+00 : f32
    %16 = vector.broadcast %cst_8 : f32 to vector<1x128xf32>
    %17 = arith.maximumf %15, %16 : vector<1x128xf32>
    %c0_9 = arith.constant 0 : index
    %c0_10 = arith.constant 0 : index
    %18 = vector.load %arg2[%c0_9, %c0_10] : memref<2x128xf32, #tpu.memory_space<vmem>>, vector<1x128xf32>
    %cst_11 = arith.constant 9.99999974E-6 : f32
    %19 = vector.broadcast %cst_11 : f32 to vector<1x128xf32>
    %20 = arith.addf %17, %19 : vector<1x128xf32>
    %21 = math.rsqrt %20 : vector<1x128xf32>
    %22 = arith.mulf %18, %21 : vector<1x128xf32>
    %c1 = arith.constant 1 : index
    %c0_12 = arith.constant 0 : index
    %23 = vector.load %arg2[%c1, %c0_12] : memref<2x128xf32, #tpu.memory_space<vmem>>, vector<1x128xf32>
    %24 = arith.mulf %11, %22 : vector<1x128xf32>
    %25 = arith.subf %23, %24 : vector<1x128xf32>
    %26 = vector.broadcast %22 : vector<1x128xf32> to vector<8x128xf32>
    %27 = arith.mulf %4, %26 : vector<8x128xf32>
    %28 = vector.broadcast %25 : vector<1x128xf32> to vector<8x128xf32>
    %29 = arith.addf %27, %28 : vector<8x128xf32>
    %c0_13 = arith.constant 0 : index
    %c0_14 = arith.constant 0 : index
    %30 = vector.load %arg3[%c0_13, %c0_14] : memref<8x128xf32, #tpu.memory_space<vmem>>, vector<8x128xf32>
    tpu.vector_store %arg3[%c0_13, %c0_14], %29 {strides = array<i32>} : memref<8x128xf32, #tpu.memory_space<vmem>>, vector<8x128xf32>,
    return
  }
}

</mosaic_0001>

<bundles_post_ra>
// kernel: tpu_custom_call.1
= control target key start
LH: loop header
LB: loop body
LE: loop exit
PB: predicated region body
PF: predicated region fallthrough
CT: control target
= control target key end

     0   :  { %8 = vsyncpa [#allocation3], 0  ;;  %s333_s0 = inlined_call_operand.hbm [shape: bf16[8,17], index: 0, kind: input, shape index: {}]   ;;  %s334_s1 = inlined_call_operand.hbm [shape: bf16[17,128], index: 1, kind: input, shape index: {}]   ;;  %s335_s2 = inlined_call_operand.vmem [shape: f32[2,128], index: 2, kind: input, shape index: {}]   ;;  %s336_s3 = inlined_call_operand.hbm [shape: f32[8,128], index: 3, kind: output, shape index: {}]  }
   0x1   :  { %9 = vsyncpa [#allocation6], 0 }
   0x2   :  { %10 = vsyncpa [#allocation4], 0  ;;  %s256_s12 = smov [#allocation2]   ;;  %s257_s14 = smov [#allocation5]  }
   0x3   :  { %s17_s13 = sshll.u32 %s256_s12, 4  ;;  %s26_s15 = sshll.u32 %s257_s14, 4  ;;  %s18_s13 = int_to_ptr.vmem [resolvable:$true] %s17_s13  ;;  %s284_s15 = int_to_ptr.vmem [resolvable:$true] %s26_s15 }
   0x4   :  { %s184_s18 = scalar_lea.hbm %s333_s0, 64 }
   0x5   :  { %p185_p0 = scmp.ne.s32.totalorder %s333_s0, %s184_s18  ;;  %p188_p1 = scmp.lt.u32.totalorder %s184_s18, %s333_s0 }
   0x7   :  { %p190_p2 = pnand %p188_p1, %p185_p0 }
   0x9   :  { %193 = shalt.err (!%p190_p2)
}
   0xa   :  { %s194_s23 = scalar_lea.vmem %s18_s13, 64  ;;  %p199_p4 = scmp.lt.s32.totalorder %s18_s13, %s18_s13 }
   0xb   :  { %p195_p3 = scmp.ne.s32.totalorder %s18_s13, %s194_s23  ;;  %p200_p5 = scmp.lt.s32.totalorder %s194_s23, %s194_s23 }
   0xd   :  { %p201_p6 = por %p200_p5, %p199_p4 }
   0xf   :  { %p202_p7 = pnand %p201_p6, %p195_p3 }
  0x11   :  { %205 = shalt.err (!%p202_p7)
}
  0x12   :  { %20 = dma.hbm_to_vmem [thread:$0]  %s333_s0, 64, %s18_s13, [#allocation3]  }
  0x13   :  { %s206_s28 = scalar_lea.hbm %s334_s1, 192 }
  0x14   :  { %p207_p8 = scmp.ne.s32.totalorder %s334_s1, %s206_s28  ;;  %p210_p9 = scmp.lt.u32.totalorder %s206_s28, %s334_s1 }
  0x16   :  { %p212_p10 = pnand %p210_p9, %p207_p8 }
  0x18   :  { %215 = shalt.err (!%p212_p10)
}
  0x19   :  { %s216_s6 = scalar_lea.vmem %s284_s15, 192  ;;  %p221_p12 = scmp.lt.s32.totalorder %s284_s15, %s284_s15 }
  0x1a   :  { %p217_p11 = scmp.ne.s32.totalorder %s284_s15, %s216_s6  ;;  %p222_p13 = scmp.lt.s32.totalorder %s216_s6, %s216_s6 }
  0x1c   :  { %p223_p0 = por %p222_p13, %p221_p12 }
  0x1e   :  { %p224_p1 = pnand %p223_p0, %p217_p11 }
  0x20   :  { %227 = shalt.err (!%p224_p1)
}
  0x21   :  { %s258_s0 = smov 64   ;;  %s259_s7 = smov 4  }
  0x22   :  { %32 = dma.hbm_to_vmem [thread:$0]  %s334_s1, 192, %s284_s15, [#allocation6], %s258_s0, %s258_s0, %s259_s7  }
  0x23   :  { %250 = dma.done.wait [#allocation3], 64  }
  0x24   :  { %251 = vsyncadd [#allocation3], 4294967232 }
  0x25   :  { %252 = dma.done.wait [#allocation6], 192  }
  0x26   :  { %253 = vsyncadd [#allocation6], 4294967104  ;;  %v260_v0 = vmov 0.0   ;;  %vm261_vm0 = vmmov 0   ;;  %vm59_vm1 = vcmask 1040384   ;;  %v180_v1 = vld [vmem:[#allocation5] sm:$0xff]   ;;  %v131_v31 = vlaneseq }
  0x27   :  { %164 = vmatprep.subr.bf16.mxu0 %v260_v0  ;;  %168 = vmatprep.mubr.msk.bf16.mxu0 %vm261_vm0, %v260_v0  ;;  %v262_v2 = vmov 0   ;;  %v181_v4 = vld [vmem:[#allocation5 + $0x8] ss:$0 sps:$4 sm:$0x11]   ;;  %v42_v6 = vld [vmem:[#allocation2] sm:$0xf] }
  0x28   :  { %v61_v3 = vsel %vm59_vm1, 65535, %v262_v2  ;;  %165 = vmatpush3.bf16.msra.mxu0 %v180_v1  ;;  %vm55_vm2 = vcmask 138240   ;;  %v132_v32 = vshrl.u32 %v131_v31, 7  ;;  %v124_v33 = vld [vmem:[%s335_s2] sm:$0x1]  ;;  %s263_s13 = smov [#allocation7]  }
  0x29   :  { %166 = vmatprep.subr.bf16.mxu0 %v260_v0  ;;  %v63_v5 = vand.u32 %v181_v4, %v61_v3  ;;  %v128_v37 = vld [vmem:[%s335_s2 + $0x1] sm:$0x1]  ;;  %s148_s14 = sshll.u32 %s263_s13, 4  ;;  %s149_s14 = int_to_ptr.vmem [resolvable:$true] %s148_s14 }
  0x2a   :  { %v133_v34 = vsub.s32 0, %v132_v32  ;;  %s228_s15 = scalar_lea.vmem %s149_s14, 128  ;;  %p233_p3 = scmp.lt.s32.totalorder %s149_s14, %s149_s14 }
  0x2b   :  { %p229_p2 = scmp.ne.s32.totalorder %s149_s14, %s228_s15  ;;  %p234_p4 = scmp.lt.s32.totalorder %s228_s15, %s228_s15 }
  0x2c   :  { %167 = vmatpush3.bf16.msra.mxu0 %v63_v5 }
  0x2d   :  { %p235_p5 = por %p234_p4, %p233_p3 }
  0x2f   :  { %169 = vmatmul.mubr.msk.bf16.vlgmr.msra.gmra.mrb[0].mxu0 %vm55_vm2, %v42_v6  ;;  %p236_p6 = pnand %p235_p5, %p229_p2 }
 0x102   :  { %v99_v7 = vpop.f32.mrb[0].mxu0 }
 0x103   :  { %v105_v8 = vmax.f32 %v99_v7, 0.0  ;;  %v170_v9 = vpop.f32.mrb[1].mxu0 }
 0x104   :  { %v102_v10 = vpop.f32.mrb[2].mxu0 }
 0x105   :  { %v106_v11 = vrot.slane %v105_v8, 4  ;;  %v112_v12 = vmul.f32 %v105_v8, %v105_v8  ;;  %v171_v13 = vpop.f32.mrb[3].mxu0 }
 0x107   :  { %v107_v14 = vadd.f32 %v106_v11, %v105_v8  ;;  %v113_v15 = vrot.slane %v112_v12, 4 }
 0x109   :  { %v108_v16 = vrot.slane %v107_v14, 2  ;;  %v114_v17 = vadd.f32 %v113_v15, %v112_v12 }
 0x10b   :  { %v109_v18 = vadd.f32 %v108_v16, %v107_v14  ;;  %v115_v19 = vrot.slane %v114_v17, 2 }
 0x10d   :  { %v110_v20 = vrot.slane %v109_v18, 1  ;;  %v116_v21 = vadd.f32 %v115_v19, %v114_v17 }
 0x10f   :  { %v117_v22 = vrot.slane %v116_v21, 1  ;;  %v111_v23 = vadd.f32 %v110_v20, %v109_v18 }
 0x111   :  { %v118_v24 = vadd.f32 %v117_v22, %v116_v21  ;;  %v119_v25 = vmul.f32 0.125, %v111_v23 }
 0x113   :  { %v120_v26 = vmul.f32 0.125, %v118_v24  ;;  %v121_v27 = vmul.f32 %v119_v25, %v119_v25 }
 0x115   :  { %v122_v28 = vsub.f32 %v120_v26, %v121_v27 }
 0x117   :  { %v123_v29 = vmax.f32 %v122_v28, 0.0 }
 0x119   :  { %v125_v30 = vadd.f32 1e-05, %v123_v29 }
 0x11b   :  { %182 = vrsqrt.f32 %v125_v30 }
 0x125   :  { %v183_v35 = vpop.eup %182 }
 0x126   :  { %v127_v36 = vmul.f32 %v183_v35, %v124_v33 }
 0x128   :  { %v129_v38 = vmul.f32 %v127_v36, %v119_v25  ;;  %v134_v39 = vrot.slane %v127_v36, %v133_v34 }
 0x12a   :  { %v130_v40 = vsub.f32 %v128_v37, %v129_v38  ;;  %v135_v41 = vmul.f32 %v134_v39, %v105_v8 }
 0x12c   :  { %v139_v42 = vrot.slane %v130_v40, %v133_v34 }
 0x12e   :  { %v140_v43 = vadd.f32 %v139_v42, %v135_v41 }
 0x130   :  { %141 = vst [vmem:[#allocation7] sm:$0xff] %v140_v43 }
 0x131   :  { %239 = shalt.err (!%p236_p6)
}
 0x132   :  { %s240_s2 = scalar_lea.hbm %s336_s3, 128 }
 0x133   :  { %p241_p7 = scmp.ne.s32.totalorder %s336_s3, %s240_s2  ;;  %p244_p8 = scmp.lt.u32.totalorder %s240_s2, %s336_s3 }
 0x135   :  { %p246_p9 = pnand %p244_p8, %p241_p7 }
 0x137   :  { %249 = shalt.err (!%p246_p9)
}
 0x138   :  { %151 = dma.vmem_to_hbm [thread:$0]  %s149_s14, 128, %s336_s3, [#allocation4]  }
 0x139   :  { %254 = dma.done.wait [#allocation4], 128  }
 0x13a   :  { %255 = vsyncadd [#allocation4], 4294967168 }
 0x13b   :  { %155 = vsyncpa [#allocation3], 1 }
 0x13c   :  { %156 = vsyncpa [#allocation6], 1 }
 0x13d   :  { %157 = vsyncpa [#allocation4], 1 }

</bundles_post_ra>
